<compile_context>
chip_gen: v5e
topology: v5e:2x2
jax: 0.10.0
libtpu: 0.0.40
codegen_flags: <defaults>
</compile_context>

<pallas_src>
import math

import jax
import jax.numpy as jnp
from jax.experimental import pallas as pl
from jax.experimental.pallas import tpu as pltpu


def _round_up(x, m):
    return ((x + m - 1) // m) * m


_W_ALIGN = 16   # bf16 sublane packing for weight-slab row offsets
_B_ALIGN = 8    # f32 sublane packing for bias-slab row offsets


# ---------------------------------------------------------------------------
# Parameter packing (done once, outside the kernel).
# ---------------------------------------------------------------------------
def pack_nbeats_params(block_params, backcast_length, mxu_dtype=jnp.bfloat16):
    """Pack per-block params into two slabs + static slice metadata.

    Weights are transposed to (out, in); theta_b|theta_f are concatenated along
    the output dim; backcast_fc/forecast_fc are packed block-diagonally with
    each half padded to an 8-row boundary.
    """
    L = backcast_length
    Lpad = _round_up(L, 8)

    max_in = 0
    for p in block_params:
        max_in = max(max_in, p["w1"].shape[0], p["w2"].shape[0],
                     2 * p["w_backcast"].shape[0])
    wcols = _round_up(max_in, 128)

    w_chunks, b_chunks, layouts = [], [], []
    w_off = [0]
    b_off = [0]

    def add_w(mat):                      # mat: (out, in) f32
        out, inn = mat.shape
        rows = _round_up(out, _W_ALIGN)
        chunk = jnp.zeros((rows, wcols), jnp.float32).at[:out, :inn].set(mat)
        w_chunks.append(chunk)
        off = w_off[0]
        w_off[0] += rows
        return off, out, inn

    def add_b(vec):                      # vec: (out,) f32
        out = vec.shape[0]
        rows = _round_up(out, _B_ALIGN)
        chunk = jnp.zeros((rows, 1), jnp.float32).at[:out, 0].set(vec)
        b_chunks.append(chunk)
        off = b_off[0]
        b_off[0] += rows
        return off

    for p in block_params:
        hidden = []
        for wname, bname in (("w1", "b1"), ("w2", "b2"),
                             ("w3", "b3"), ("w4", "b4")):
            woff, out, inn = add_w(p[wname].T)
            boff = add_b(p[bname].reshape(-1))
            hidden.append((woff, out, inn, boff))

        # theta_b and theta_f share the same input -> one (2*td, units) matmul.
        td = p["w_theta_b"].shape[1]
        w_theta = jnp.concatenate([p["w_theta_b"].T, p["w_theta_f"].T], axis=0)
        b_theta = jnp.concatenate([p["b_theta_b"].reshape(-1),
                                   p["b_theta_f"].reshape(-1)])
        woff, out, inn = add_w(w_theta)
        boff = add_b(b_theta)
        theta_spec = (woff, out, inn, boff)

        # backcast_fc / forecast_fc fused into one block-diagonal matmul.
        w_bd = jnp.zeros((2 * Lpad, 2 * td), jnp.float32)
        w_bd = w_bd.at[:L, :td].set(p["w_backcast"].T)
        w_bd = w_bd.at[Lpad:Lpad + L, td:].set(p["w_forecast"].T)
        b_bd = jnp.zeros((2 * Lpad,), jnp.float32)
        b_bd = b_bd.at[:L].set(p["b_backcast"].reshape(-1))
        b_bd = b_bd.at[Lpad:Lpad + L].set(p["b_forecast"].reshape(-1))
        woff, out, inn = add_w(w_bd)
        boff = add_b(b_bd)
        out_spec = (woff, out, inn, boff)

        layouts.append((tuple(hidden), theta_spec, out_spec))

    w_slab = jnp.concatenate(w_chunks, axis=0).astype(mxu_dtype)
    b_slab = jnp.concatenate(b_chunks, axis=0)          # f32, (rows, 1)
    return dict(w_slab=w_slab, b_slab=b_slab, layouts=tuple(layouts),
                L=L, Lpad=Lpad)


# ---------------------------------------------------------------------------
# Kernel: entire N-Beats forward for one batch-column tile, all in VMEM.
# ---------------------------------------------------------------------------
def _make_nbeats_kernel(layouts, L, Lpad, compute_dtype):
    def kernel(x_ref, w_ref, b_ref, backcast_ref, forecast_ref):
        def dense(h, spec, relu):
            w_off, out, inn, b_off = spec
            w = w_ref[w_off:w_off + out, 0:inn]                     # (out, in)
            y = jnp.dot(w, h.astype(compute_dtype),
                        preferred_element_type=jnp.float32)         # (out, TB)
            y = y + b_ref[b_off:b_off + out, :]                     # + (out, 1)
            return jnp.maximum(y, 0.0) if relu else y

        backcast = x_ref[...].astype(jnp.float32)                   # (L, TB)
        forecast = jnp.zeros_like(backcast)

        for hidden, theta_spec, out_spec in layouts:                # static
            h = backcast
            for spec in hidden:                                     # fc1..fc4
                h = dense(h, spec, relu=True)
            theta = dense(h, theta_spec, relu=True)                 # (2*td, TB)
            bf = dense(theta, out_spec, relu=False)                 # (2*Lpad, TB)
            backcast = backcast - bf[0:L, :]
            forecast = forecast + bf[Lpad:Lpad + L, :]

        backcast_ref[...] = backcast.astype(backcast_ref.dtype)
        forecast_ref[...] = forecast.astype(forecast_ref.dtype)

    return kernel


def nbeats_forward(backcast, packed, *, col_tile=None):
    """backcast: (B, L) f32.  packed: output of pack_nbeats_params.

    Returns (backcast_out, forecast_out), each (B, L), matching NBeatsNet.forward.
    """
    B, L = backcast.shape
    assert L == packed["L"]
    w_slab, b_slab = packed["w_slab"], packed["b_slab"]

    b_lane = _round_up(B, 128)
    if col_tile is None:
        if b_lane <= 256:
            col_tile = b_lane                     # one lane-dense tile
        else:
            # >=2 tiles (shards across v7x's two TCs), 256-multiples for the
            # 2x256 MXU on v6e/v7x, capped so per-step work stays VMEM-trivial.
            col_tile = min(2048, _round_up(pl.cdiv(b_lane, 2), 256))
    b_pad = _round_up(B, col_tile)

    x_t = backcast.T                              # (L, B): batch on lanes
    if b_pad != B:
        x_t = jnp.pad(x_t, ((0, 0), (0, b_pad - B)))

    kernel = _make_nbeats_kernel(packed["layouts"], L, packed["Lpad"],
                                 w_slab.dtype)
    io_spec = pl.BlockSpec((L, col_tile), lambda i: (0, i))

    backcast_t, forecast_t = pl.pallas_call(
        kernel,
        out_shape=(jax.ShapeDtypeStruct((L, b_pad), backcast.dtype),
                   jax.ShapeDtypeStruct((L, b_pad), backcast.dtype)),
        grid_spec=pltpu.PrefetchScalarGridSpec(
            num_scalar_prefetch=0,
            grid=(b_pad // col_tile,),
            in_specs=[io_spec,
                      pl.BlockSpec(w_slab.shape, lambda i: (0, 0)),
                      pl.BlockSpec(b_slab.shape, lambda i: (0, 0))],
            out_specs=(io_spec, io_spec)),
        compiler_params=pltpu.CompilerParams(
            dimension_semantics=("parallel",)),
    )(x_t, w_slab, b_slab)

    return backcast_t[:, :B].T, forecast_t[:, :B].T


# ---------------------------------------------------------------------------
# Parameter init (matches torch.nn.Linear defaults) and pure-JAX reference.
# ---------------------------------------------------------------------------
def make_generic_block_params(key, units, thetas_dim, backcast_length,
                              dtype=jnp.float32):
    """GenericBlock params. Weights stored as (in_features, out_features)."""

    def linear_init(k, fan_in, fan_out):
        bound = 1.0 / math.sqrt(fan_in)
        kw, kb = jax.random.split(k)
        w = jax.random.uniform(kw, (fan_in, fan_out), dtype, -bound, bound)
        b = jax.random.uniform(kb, (1, fan_out), dtype, -bound, bound)
        return w, b

    ks = jax.random.split(key, 8)
    p = {}
    p["w1"], p["b1"] = linear_init(ks[0], backcast_length, units)
    p["w2"], p["b2"] = linear_init(ks[1], units, units)
    p["w3"], p["b3"] = linear_init(ks[2], units, units)
    p["w4"], p["b4"] = linear_init(ks[3], units, units)
    p["w_theta_b"], p["b_theta_b"] = linear_init(ks[4], units, thetas_dim)
    p["w_theta_f"], p["b_theta_f"] = linear_init(ks[5], units, thetas_dim)
    p["w_backcast"], p["b_backcast"] = linear_init(ks[6], thetas_dim, backcast_length)
    # PyTorch quirk: forecast_fc = nn.Linear(thetas_dim, backcast_length)
    p["w_forecast"], p["b_forecast"] = linear_init(ks[7], thetas_dim, backcast_length)
    return p


def _reference_forward(backcast, block_params, mxu_dtype=None):
    """Pure-JAX replica of NBeatsNet.forward.

    mxu_dtype=jnp.bfloat16 mimics the kernel's bf16-operand / f32-accumulate
    matmul contract; None keeps full-f32 (PyTorch) semantics.
    """
    def dot(a, b):
        if mxu_dtype is not None:
            a = a.astype(mxu_dtype)
            b = b.astype(mxu_dtype)
        return jnp.dot(a, b, preferred_element_type=jnp.float32)

    relu = jax.nn.relu
    forecast = jnp.zeros_like(backcast)
    for p in block_params:
        h = relu(dot(backcast, p["w1"]) + p["b1"])
        h = relu(dot(h, p["w2"]) + p["b2"])
        h = relu(dot(h, p["w3"]) + p["b3"])
        h = relu(dot(h, p["w4"]) + p["b4"])
        tb = relu(dot(h, p["w_theta_b"]) + p["b_theta_b"])
        tf = relu(dot(h, p["w_theta_f"]) + p["b_theta_f"])
        b = dot(tb, p["w_backcast"]) + p["b_backcast"]
        f = dot(tf, p["w_forecast"]) + p["b_forecast"]
        backcast = backcast - b
        forecast = forecast + f
    return backcast, forecast


if __name__ == "__main__":
    # NBeatsNet defaults: 2 stacks x 1 block, all GenericBlock;
    # input_size (backcast_length)=10, hidden_layer_units=17, thetas_dims=(4, 8).
    backcast_length = 10
    units = 17
    thetas_dims = (4, 8)
    nb_blocks_per_stack = 1

    key = jax.random.PRNGKey(0)
    k_x, k_p = jax.random.split(key)

    n_total_blocks = len(thetas_dims) * nb_blocks_per_stack
    block_keys = jax.random.split(k_p, n_total_blocks)
    block_params = []
    idx = 0
    for stack_id in range(len(thetas_dims)):
        for _ in range(nb_blocks_per_stack):
            block_params.append(
                make_generic_block_params(block_keys[idx], units,
                                          thetas_dims[stack_id],
                                          backcast_length))
            idx += 1

    packed = pack_nbeats_params(block_params, backcast_length)   # bf16 weights

    # batch=2: single 128-lane tile.  batch=300: 2 tiles of 256 lanes + padding.
    for batch in (2, 300):
        kx = jax.random.fold_in(k_x, batch)
        x = jax.random.normal(kx, (batch, backcast_length), jnp.float32)

        backcast_out, forecast_out = nbeats_forward(x, packed)
        backcast_out = jax.block_until_ready(backcast_out)
        forecast_out = jax.block_until_ready(forecast_out)
        assert backcast_out.shape == (batch, backcast_length)
        assert forecast_out.shape == (batch, backcast_length)

        # Tight check vs a reference using the same bf16-operand matmul contract.
        rb16, rf16 = _reference_forward(x, block_params, mxu_dtype=jnp.bfloat16)
        assert jnp.allclose(backcast_out, rb16, atol=1e-4, rtol=1e-4)
        assert jnp.allclose(forecast_out, rf16, atol=1e-4, rtol=1e-4)

        # Looser sanity check vs full-f32 PyTorch semantics (bf16 MXU operands).
        rb32, rf32 = _reference_forward(x, block_params)
        assert jnp.allclose(backcast_out, rb32, atol=5e-2, rtol=5e-2)
        assert jnp.allclose(forecast_out, rf32, atol=5e-2, rtol=5e-2)

    print("KERNEL_OK")
</pallas_src>

<mosaic_0001>
module attributes {stable_mosaic.version = 11 : i64} {
  func.func @kernel(%arg0: i32, %arg1: memref<10x128xf32, #tpu.memory_space<vmem>>, %arg2: memref<352x128xbf16, #tpu.memory_space<vmem>>, %arg3: memref<280x1xf32, #tpu.memory_space<vmem>>, %arg4: memref<10x128xf32, #tpu.memory_space<vmem>>, %arg5: memref<10x128xf32, #tpu.memory_space<vmem>>) attributes {dimension_semantics = [#tpu.dimension_semantics<parallel>], iteration_bounds = array<i64: 1>, scalar_prefetch = 0 : i64, scratch_operands = 0 : i64, tpu.core_type = #tpu.core_type<tc>, window_params = [{transform_indices = @transform_0, window_bounds = array<i64: 10, 128>}, {pipeline_mode = #tpu.pipeline_mode<synchronous>, transform_indices = @transform_1, window_bounds = array<i64: 352, 128>}, {pipeline_mode = #tpu.pipeline_mode<synchronous>, transform_indices = @transform_2, window_bounds = array<i64: 280, 1>}, {transform_indices = @transform_3, window_bounds = array<i64: 10, 128>}, {transform_indices = @transform_4, window_bounds = array<i64: 10, 128>}]} {
    %c0 = arith.constant 0 : index
    %c0_0 = arith.constant 0 : index
    %0 = vector.load %arg1[%c0, %c0_0] : memref<10x128xf32, #tpu.memory_space<vmem>>, vector<10x128xf32>
    %cst = arith.constant 0.000000e+00 : f32
    %1 = vector.broadcast %cst : f32 to vector<10x128xf32>
    %c0_1 = arith.constant 0 : index
    %c0_2 = arith.constant 0 : index
    %2 = vector.load %arg2[%c0_1, %c0_2] : memref<352x128xbf16, #tpu.memory_space<vmem>>, vector<17x10xbf16>
    %3 = arith.truncf %0 : vector<10x128xf32> to vector<10x128xbf16>
    %cst_3 = arith.constant dense<0.000000e+00> : vector<17x128xf32>
    %4 = tpu.matmul %2, %3, %cst_3 {dimension_numbers = #tpu.dot_dimension_numbers<[1], [0], [0], [1], [0, 0, 1, 1], [], []>} : vector<17x10xbf16>, vector<10x128xbf16>, vector<17x128xf32> -> vector<17x128xf32>
    %c0_4 = arith.constant 0 : index
    %c0_5 = arith.constant 0 : index
    %5 = vector.load %arg3[%c0_4, %c0_5] : memref<280x1xf32, #tpu.memory_space<vmem>>, vector<17x1xf32>
    %6 = vector.broadcast %5 : vector<17x1xf32> to vector<17x128xf32>
    %7 = arith.addf %4, %6 : vector<17x128xf32>
    %cst_6 = arith.constant 0.000000e+00 : f32
    %8 = vector.broadcast %cst_6 : f32 to vector<17x128xf32>
    %9 = arith.maximumf %7, %8 : vector<17x128xf32>
    %c32 = arith.constant 32 : index
    %c0_7 = arith.constant 0 : index
    %10 = vector.load %arg2[%c32, %c0_7] : memref<352x128xbf16, #tpu.memory_space<vmem>>, vector<17x17xbf16>
    %11 = arith.truncf %9 : vector<17x128xf32> to vector<17x128xbf16>
    %cst_8 = arith.constant dense<0.000000e+00> : vector<17x128xf32>
    %12 = tpu.matmul %10, %11, %cst_8 {dimension_numbers = #tpu.dot_dimension_numbers<[1], [0], [0], [1], [0, 0, 1, 1], [], []>} : vector<17x17xbf16>, vector<17x128xbf16>, vector<17x128xf32> -> vector<17x128xf32>
    %c24 = arith.constant 24 : index
    %c0_9 = arith.constant 0 : index
    %13 = vector.load %arg3[%c24, %c0_9] : memref<280x1xf32, #tpu.memory_space<vmem>>, vector<17x1xf32>
    %14 = vector.broadcast %13 : vector<17x1xf32> to vector<17x128xf32>
    %15 = arith.addf %12, %14 : vector<17x128xf32>
    %cst_10 = arith.constant 0.000000e+00 : f32
    %16 = vector.broadcast %cst_10 : f32 to vector<17x128xf32>
    %17 = arith.maximumf %15, %16 : vector<17x128xf32>
    %c64 = arith.constant 64 : index
    %c0_11 = arith.constant 0 : index
    %18 = vector.load %arg2[%c64, %c0_11] : memref<352x128xbf16, #tpu.memory_space<vmem>>, vector<17x17xbf16>
    %19 = arith.truncf %17 : vector<17x128xf32> to vector<17x128xbf16>
    %cst_12 = arith.constant dense<0.000000e+00> : vector<17x128xf32>
    %20 = tpu.matmul %18, %19, %cst_12 {dimension_numbers = #tpu.dot_dimension_numbers<[1], [0], [0], [1], [0, 0, 1, 1], [], []>} : vector<17x17xbf16>, vector<17x128xbf16>, vector<17x128xf32> -> vector<17x128xf32>
    %c48 = arith.constant 48 : index
    %c0_13 = arith.constant 0 : index
    %21 = vector.load %arg3[%c48, %c0_13] : memref<280x1xf32, #tpu.memory_space<vmem>>, vector<17x1xf32>
    %22 = vector.broadcast %21 : vector<17x1xf32> to vector<17x128xf32>
    %23 = arith.addf %20, %22 : vector<17x128xf32>
    %cst_14 = arith.constant 0.000000e+00 : f32
    %24 = vector.broadcast %cst_14 : f32 to vector<17x128xf32>
    %25 = arith.maximumf %23, %24 : vector<17x128xf32>
    %c96 = arith.constant 96 : index
    %c0_15 = arith.constant 0 : index
    %26 = vector.load %arg2[%c96, %c0_15] : memref<352x128xbf16, #tpu.memory_space<vmem>>, vector<17x17xbf16>
    %27 = arith.truncf %25 : vector<17x128xf32> to vector<17x128xbf16>
    %cst_16 = arith.constant dense<0.000000e+00> : vector<17x128xf32>
    %28 = tpu.matmul %26, %27, %cst_16 {dimension_numbers = #tpu.dot_dimension_numbers<[1], [0], [0], [1], [0, 0, 1, 1], [], []>} : vector<17x17xbf16>, vector<17x128xbf16>, vector<17x128xf32> -> vector<17x128xf32>
    %c72 = arith.constant 72 : index
    %c0_17 = arith.constant 0 : index
    %29 = vector.load %arg3[%c72, %c0_17] : memref<280x1xf32, #tpu.memory_space<vmem>>, vector<17x1xf32>
    %30 = vector.broadcast %29 : vector<17x1xf32> to vector<17x128xf32>
    %31 = arith.addf %28, %30 : vector<17x128xf32>
    %cst_18 = arith.constant 0.000000e+00 : f32
    %32 = vector.broadcast %cst_18 : f32 to vector<17x128xf32>
    %33 = arith.maximumf %31, %32 : vector<17x128xf32>
    %c128 = arith.constant 128 : index
    %c0_19 = arith.constant 0 : index
    %34 = vector.load %arg2[%c128, %c0_19] : memref<352x128xbf16, #tpu.memory_space<vmem>>, vector<8x17xbf16>
    %35 = arith.truncf %33 : vector<17x128xf32> to vector<17x128xbf16>
    %cst_20 = arith.constant dense<0.000000e+00> : vector<8x128xf32>
    %36 = tpu.matmul %34, %35, %cst_20 {dimension_numbers = #tpu.dot_dimension_numbers<[1], [0], [0], [1], [0, 0, 1, 1], [], []>} : vector<8x17xbf16>, vector<17x128xbf16>, vector<8x128xf32> -> vector<8x128xf32>
    %c96_21 = arith.constant 96 : index
    %c0_22 = arith.constant 0 : index
    %37 = vector.load %arg3[%c96_21, %c0_22] : memref<280x1xf32, #tpu.memory_space<vmem>>, vector<8x1xf32>
    %38 = vector.broadcast %37 : vector<8x1xf32> to vector<8x128xf32>
    %39 = arith.addf %36, %38 : vector<8x128xf32>
    %cst_23 = arith.constant 0.000000e+00 : f32
    %40 = vector.broadcast %cst_23 : f32 to vector<8x128xf32>
    %41 = arith.maximumf %39, %40 : vector<8x128xf32>
    %c144 = arith.constant 144 : index
    %c0_24 = arith.constant 0 : index
    %42 = vector.load %arg2[%c144, %c0_24] : memref<352x128xbf16, #tpu.memory_space<vmem>>, vector<32x8xbf16>
    %43 = arith.truncf %41 : vector<8x128xf32> to vector<8x128xbf16>
    %cst_25 = arith.constant dense<0.000000e+00> : vector<32x128xf32>
    %44 = tpu.matmul %42, %43, %cst_25 {dimension_numbers = #tpu.dot_dimension_numbers<[1], [0], [0], [1], [0, 0, 1, 1], [], []>} : vector<32x8xbf16>, vector<8x128xbf16>, vector<32x128xf32> -> vector<32x128xf32>
    %c104 = arith.constant 104 : index
    %c0_26 = arith.constant 0 : index
    %45 = vector.load %arg3[%c104, %c0_26] : memref<280x1xf32, #tpu.memory_space<vmem>>, vector<32x1xf32>
    %46 = vector.broadcast %45 : vector<32x1xf32> to vector<32x128xf32>
    %47 = arith.addf %44, %46 : vector<32x128xf32>
    %48 = vector.extract_strided_slice %47 {offsets = [0, 0], sizes = [10, 128], strides = [1, 1]} : vector<32x128xf32> to vector<10x128xf32>
    %49 = arith.subf %0, %48 : vector<10x128xf32>
    %50 = vector.extract_strided_slice %47 {offsets = [16, 0], sizes = [10, 128], strides = [1, 1]} : vector<32x128xf32> to vector<10x128xf32>
    %51 = arith.addf %1, %50 : vector<10x128xf32>
    %c176 = arith.constant 176 : index
    %c0_27 = arith.constant 0 : index
    %52 = vector.load %arg2[%c176, %c0_27] : memref<352x128xbf16, #tpu.memory_space<vmem>>, vector<17x10xbf16>
    %53 = arith.truncf %49 : vector<10x128xf32> to vector<10x128xbf16>
    %cst_28 = arith.constant dense<0.000000e+00> : vector<17x128xf32>
    %54 = tpu.matmul %52, %53, %cst_28 {dimension_numbers = #tpu.dot_dimension_numbers<[1], [0], [0], [1], [0, 0, 1, 1], [], []>} : vector<17x10xbf16>, vector<10x128xbf16>, vector<17x128xf32> -> vector<17x128xf32>
    %c136 = arith.constant 136 : index
    %c0_29 = arith.constant 0 : index
    %55 = vector.load %arg3[%c136, %c0_29] : memref<280x1xf32, #tpu.memory_space<vmem>>, vector<17x1xf32>
    %56 = vector.broadcast %55 : vector<17x1xf32> to vector<17x128xf32>
    %57 = arith.addf %54, %56 : vector<17x128xf32>
    %cst_30 = arith.constant 0.000000e+00 : f32
    %58 = vector.broadcast %cst_30 : f32 to vector<17x128xf32>
    %59 = arith.maximumf %57, %58 : vector<17x128xf32>
    %c208 = arith.constant 208 : index
    %c0_31 = arith.constant 0 : index
    %60 = vector.load %arg2[%c208, %c0_31] : memref<352x128xbf16, #tpu.memory_space<vmem>>, vector<17x17xbf16>
    %61 = arith.truncf %59 : vector<17x128xf32> to vector<17x128xbf16>
    %cst_32 = arith.constant dense<0.000000e+00> : vector<17x128xf32>
    %62 = tpu.matmul %60, %61, %cst_32 {dimension_numbers = #tpu.dot_dimension_numbers<[1], [0], [0], [1], [0, 0, 1, 1], [], []>} : vector<17x17xbf16>, vector<17x128xbf16>, vector<17x128xf32> -> vector<17x128xf32>
    %c160 = arith.constant 160 : index
    %c0_33 = arith.constant 0 : index
    %63 = vector.load %arg3[%c160, %c0_33] : memref<280x1xf32, #tpu.memory_space<vmem>>, vector<17x1xf32>
    %64 = vector.broadcast %63 : vector<17x1xf32> to vector<17x128xf32>
    %65 = arith.addf %62, %64 : vector<17x128xf32>
    %cst_34 = arith.constant 0.000000e+00 : f32
    %66 = vector.broadcast %cst_34 : f32 to vector<17x128xf32>
    %67 = arith.maximumf %65, %66 : vector<17x128xf32>
    %c240 = arith.constant 240 : index
    %c0_35 = arith.constant 0 : index
    %68 = vector.load %arg2[%c240, %c0_35] : memref<352x128xbf16, #tpu.memory_space<vmem>>, vector<17x17xbf16>
    %69 = arith.truncf %67 : vector<17x128xf32> to vector<17x128xbf16>
    %cst_36 = arith.constant dense<0.000000e+00> : vector<17x128xf32>
    %70 = tpu.matmul %68, %69, %cst_36 {dimension_numbers = #tpu.dot_dimension_numbers<[1], [0], [0], [1], [0, 0, 1, 1], [], []>} : vector<17x17xbf16>, vector<17x128xbf16>, vector<17x128xf32> -> vector<17x128xf32>
    %c184 = arith.constant 184 : index
    %c0_37 = arith.constant 0 : index
    %71 = vector.load %arg3[%c184, %c0_37] : memref<280x1xf32, #tpu.memory_space<vmem>>, vector<17x1xf32>
    %72 = vector.broadcast %71 : vector<17x1xf32> to vector<17x128xf32>
    %73 = arith.addf %70, %72 : vector<17x128xf32>
    %cst_38 = arith.constant 0.000000e+00 : f32
    %74 = vector.broadcast %cst_38 : f32 to vector<17x128xf32>
    %75 = arith.maximumf %73, %74 : vector<17x128xf32>
    %c272 = arith.constant 272 : index
    %c0_39 = arith.constant 0 : index
    %76 = vector.load %arg2[%c272, %c0_39] : memref<352x128xbf16, #tpu.memory_space<vmem>>, vector<17x17xbf16>
    %77 = arith.truncf %75 : vector<17x128xf32> to vector<17x128xbf16>
    %cst_40 = arith.constant dense<0.000000e+00> : vector<17x128xf32>
    %78 = tpu.matmul %76, %77, %cst_40 {dimension_numbers = #tpu.dot_dimension_numbers<[1], [0], [0], [1], [0, 0, 1, 1], [], []>} : vector<17x17xbf16>, vector<17x128xbf16>, vector<17x128xf32> -> vector<17x128xf32>
    %c208_41 = arith.constant 208 : index
    %c0_42 = arith.constant 0 : index
    %79 = vector.load %arg3[%c208_41, %c0_42] : memref<280x1xf32, #tpu.memory_space<vmem>>, vector<17x1xf32>
    %80 = vector.broadcast %79 : vector<17x1xf32> to vector<17x128xf32>
    %81 = arith.addf %78, %80 : vector<17x128xf32>
    %cst_43 = arith.constant 0.000000e+00 : f32
    %82 = vector.broadcast %cst_43 : f32 to vector<17x128xf32>
    %83 = arith.maximumf %81, %82 : vector<17x128xf32>
    %c304 = arith.constant 304 : index
    %c0_44 = arith.constant 0 : index
    %84 = vector.load %arg2[%c304, %c0_44] : memref<352x128xbf16, #tpu.memory_space<vmem>>, vector<16x17xbf16>
    %85 = arith.truncf %83 : vector<17x128xf32> to vector<17x128xbf16>
    %cst_45 = arith.constant dense<0.000000e+00> : vector<16x128xf32>
    %86 = tpu.matmul %84, %85, %cst_45 {dimension_numbers = #tpu.dot_dimension_numbers<[1], [0], [0], [1], [0, 0, 1, 1], [], []>} : vector<16x17xbf16>, vector<17x128xbf16>, vector<16x128xf32> -> vector<16x128xf32>
    %c232 = arith.constant 232 : index
    %c0_46 = arith.constant 0 : index
    %87 = vector.load %arg3[%c232, %c0_46] : memref<280x1xf32, #tpu.memory_space<vmem>>, vector<16x1xf32>
    %88 = vector.broadcast %87 : vector<16x1xf32> to vector<16x128xf32>
    %89 = arith.addf %86, %88 : vector<16x128xf32>
    %cst_47 = arith.constant 0.000000e+00 : f32
    %90 = vector.broadcast %cst_47 : f32 to vector<16x128xf32>
    %91 = arith.maximumf %89, %90 : vector<16x128xf32>
    %c320 = arith.constant 320 : index
    %c0_48 = arith.constant 0 : index
    %92 = vector.load %arg2[%c320, %c0_48] : memref<352x128xbf16, #tpu.memory_space<vmem>>, vector<32x16xbf16>
    %93 = arith.truncf %91 : vector<16x128xf32> to vector<16x128xbf16>
    %cst_49 = arith.constant dense<0.000000e+00> : vector<32x128xf32>
    %94 = tpu.matmul %92, %93, %cst_49 {dimension_numbers = #tpu.dot_dimension_numbers<[1], [0], [0], [1], [0, 0, 1, 1], [], []>} : vector<32x16xbf16>, vector<16x128xbf16>, vector<32x128xf32> -> vector<32x128xf32>
    %c248 = arith.constant 248 : index
    %c0_50 = arith.constant 0 : index
    %95 = vector.load %arg3[%c248, %c0_50] : memref<280x1xf32, #tpu.memory_space<vmem>>, vector<32x1xf32>
    %96 = vector.broadcast %95 : vector<32x1xf32> to vector<32x128xf32>
    %97 = arith.addf %94, %96 : vector<32x128xf32>
    %98 = vector.extract_strided_slice %97 {offsets = [0, 0], sizes = [10, 128], strides = [1, 1]} : vector<32x128xf32> to vector<10x128xf32>
    %99 = arith.subf %49, %98 : vector<10x128xf32>
    %100 = vector.extract_strided_slice %97 {offsets = [16, 0], sizes = [10, 128], strides = [1, 1]} : vector<32x128xf32> to vector<10x128xf32>
    %101 = arith.addf %51, %100 : vector<10x128xf32>
    %c0_51 = arith.constant 0 : index
    %c0_52 = arith.constant 0 : index
    %102 = vector.load %arg4[%c0_51, %c0_52] : memref<10x128xf32, #tpu.memory_space<vmem>>, vector<10x128xf32>
    tpu.vector_store %arg4[%c0_51, %c0_52], %99 {strides = array<i32>} : memref<10x128xf32, #tpu.memory_space<vmem>>, vector<10x128xf32>,
    %c0_53 = arith.constant 0 : index
    %c0_54 = arith.constant 0 : index
    %103 = vector.load %arg5[%c0_53, %c0_54] : memref<10x128xf32, #tpu.memory_space<vmem>>, vector<10x128xf32>
    tpu.vector_store %arg5[%c0_53, %c0_54], %101 {strides = array<i32>} : memref<10x128xf32, #tpu.memory_space<vmem>>, vector<10x128xf32>,
    return
  }
  func.func @transform_0(%arg0: i32) -> (i32, i32) {
    %c0_i32 = arith.constant 0 : i32
    %c0_i32_0 = arith.constant 0 : i32
    return %c0_i32, %arg0 : i32, i32
  }
  func.func @transform_1(%arg0: i32) -> (i32, i32) {
    %c0_i32 = arith.constant 0 : i32
    %c0_i32_0 = arith.constant 0 : i32
    %c0_i32_1 = arith.constant 0 : i32
    return %c0_i32, %c0_i32_0 : i32, i32
  }
  func.func @transform_2(%arg0: i32) -> (i32, i32) {
    %c0_i32 = arith.constant 0 : i32
    %c0_i32_0 = arith.constant 0 : i32
    %c0_i32_1 = arith.constant 0 : i32
    return %c0_i32, %c0_i32_0 : i32, i32
  }
  func.func @transform_3(%arg0: i32) -> (i32, i32) {
    %c0_i32 = arith.constant 0 : i32
    %c0_i32_0 = arith.constant 0 : i32
    return %c0_i32, %arg0 : i32, i32
  }
  func.func @transform_4(%arg0: i32) -> (i32, i32) {
    %c0_i32 = arith.constant 0 : i32
    %c0_i32_0 = arith.constant 0 : i32
    return %c0_i32, %arg0 : i32, i32
  }
}

</mosaic_0001>

<bundles_post_ra>
// kernel: tpu_custom_call.1
= control target key start
LH: loop header
LB: loop body
LE: loop exit
PB: predicated region body
PF: predicated region fallthrough
CT: control target
= control target key end

     0   :  { %10 = vsyncpa [#allocation3], 0  ;;  %v916_v3 = vmov 0   ;;  %vm58_vm0 = vcmask 1044480   ;;  %vm51_vm1 = vcmask 80896   ;;  %s1182_s0 = inlined_call_operand.vmem [shape: f32[10,128], index: 0, kind: input, shape index: {}]   ;;  %s1183_s1 = inlined_call_operand.vmem [shape: bf16[352,128], index: 1, kind: input, shape index: {}]   ;;  %s1184_s2 = inlined_call_operand.vmem [shape: f32[280,1], index: 2, kind: input, shape index: {}]   ;;  %s1185_s3 = inlined_call_operand.hbm [shape: f32[10,128], index: 3, kind: output, shape index: {0}]   ;;  %s1186_s4 = inlined_call_operand.hbm [shape: f32[10,128], index: 4, kind: output, shape index: {1}]  }
   0x1   :  { %v27_v0 = vld [vmem:[%s1184_s2 + $0x10] sm:$0x1]  ;;  %v26_v1 = vld [vmem:[%s1184_s2 + $0x8] sm:$0xff]  ;;  %v955_v2 = vld [vmem:[%s1182_s0] sm:$0xff]  ;;  %862 = vset.pattern.permute.xlu1 %v916_v3  ;;  %861 = vset.pattern.permute.xlu0 %v916_v3 }
   0x2   :  { %v962_v4 = vld [vmem:[%s1182_s0 + $0x8] sm:$0x3]  ;;  %40 = vperm.xlu0 %861, %v27_v0   ;;  %35 = vperm.xlu1 %862, %v26_v1   ;;  %v841_v7 = vld [vmem:[%s1183_s1] sm:$0xff] }
   0x3   :  { %v24_v5 = vpack.c.bf16 %v962_v4, %v955_v2  ;;  %863 = vset.pattern.permute.xlu2 %v916_v3 }
   0x5   :  { %v60_v6 = vsel %vm58_vm0, %v24_v5, 0 }
   0x6   :  { %69 = vmatpush.bf16.msra.mxu0 %v60_v6 }
   0x7   :  { %11 = vsyncpa [#allocation5], 0  ;;  %v90_v8 = vld [vmem:[%s1184_s2 + $0x28] sm:$0x1]  ;;  %v25_v9 = vld [vmem:[%s1184_s2] sm:$0xff]  ;;  %vm121_vm2 = vcmask 1040384  }
   0x8   :  { %v23_v10 = vld [vmem:[%s1183_s1 + $0x8] sm:$0x1]  ;;  %v153_v11 = vld [vmem:[%s1184_s2 + $0x30] sm:$0xff]  ;;  %v155_v12 = vld [vmem:[%s1184_s2 + $0x40] sm:$0x1]  ;;  %v1070_v50 = vsel %vm121_vm2, 65535, %v916_v3 }
   0x9   :  { %771 = vmatmul.msk.bf16.vlgmr.msra.gmra.mxu0 %vm51_vm1, %v841_v7  ;;  %v48_v13 = vunpack.c.l.b16 %v23_v10  ;;  %v214_v15 = vld [vmem:[%s1184_s2 + $0x48] sm:$0xff]  ;;  %v216_v16 = vld [vmem:[%s1184_s2 + $0x58] sm:$0x1]  ;;  %v273_v18 = vld [vmem:[%s1184_s2 + $0x60] sm:$0xff]  ;;  %vm114_vm3 = vcmask 138240   ;;  %vm345_vm4 = vcmask 1043456  }
   0xa   :  { %103 = vperm.xlu1 %862, %v90_v8   ;;  %30 = vperm.xlu0 %861, %v25_v9   ;;  %v304_v17 = vld [vmem:[%s1184_s2 + $0x68] sm:$0xff]  ;;  %v378_v20 = vld [vmem:[%s1184_s2 + $0x98] sm:$0x1]  ;;  %v437_v21 = vld [vmem:[%s1184_s2 + $0xa0] sm:$0xff]  ;;  %vm338_vm5 = vcmask 64512   ;;  %vm697_vm6 = vcmask 130048  }
   0xb   :  { %v50_v14 = vpack.c.b16 %v48_v13, %v48_v13  ;;  %v376_v19 = vld [vmem:[%s1184_s2 + $0x88] sm:$0xff]  ;;  %v439_v22 = vld [vmem:[%s1184_s2 + $0xb0] sm:$0x1]  ;;  %v498_v23 = vld [vmem:[%s1184_s2 + $0xb8] sm:$0xff]  ;;  %s917_s23 = smov [#allocation2]   ;;  %s737_s26 = sshll.u32 %s1185_s3, 4  ;;  %s738_s26 = int_to_ptr.hbm [resolvable:$true] %s737_s26 }
   0xc   :  { %v500_v24 = vld [vmem:[%s1184_s2 + $0xc8] sm:$0x1]  ;;  %v559_v25 = vld [vmem:[%s1184_s2 + $0xd0] sm:$0xff]  ;;  %v561_v26 = vld [vmem:[%s1184_s2 + $0xe0] sm:$0x1]  ;;  %s735_s24 = sshll.u32 %s917_s23, 4  ;;  %s736_s24 = int_to_ptr.vmem [resolvable:$true] %s735_s24 }
   0xd   :  { %v620_v27 = vld [vmem:[%s1184_s2 + $0xf0] sm:$0xff]  ;;  %v619_v28 = vld [vmem:[%s1184_s2 + $0xe8] sm:$0xff]  ;;  %v663_v29 = vld [vmem:[%s1184_s2 + $0xf8] sm:$0xff]  ;;  %s919_s27 = smov 8   ;;  %s920_s3 = smov [#allocation4]  }
   0xe   :  { %v307_v30 = vld [vmem:[%s1184_s2 + $0x80] sm:$0xff]  ;;  %v88_v31 = vld [vmem:[%s1184_s2 + $0x18] sm:$0xff]  ;;  %v666_v32 = vld [vmem:[%s1184_s2 + $0x110] sm:$0xff]  ;;  %s748_s28 = sshll.u32 %s920_s3, 4  ;;  %s750_s5 = sshll.u32 %s1186_s4, 4  ;;  %s749_s28 = int_to_ptr.vmem [resolvable:$true] %s748_s28  ;;  %s751_s5 = int_to_ptr.hbm [resolvable:$true] %s750_s5 }
   0xf   :  { %93 = vperm.xlu2 %863, %v88_v31   ;;  %v665_v33 = vld [vmem:[%s1184_s2 + $0x108] sm:$0xff]  ;;  %v89_v34 = vld [vmem:[%s1184_s2 + $0x20] sm:$0xff]  ;;  %v154_v35 = vld [vmem:[%s1184_s2 + $0x38] sm:$0xff] }
  0x10   :  { %v215_v36 = vld [vmem:[%s1184_s2 + $0x50] sm:$0xff]  ;;  %v438_v40 = vld [vmem:[%s1184_s2 + $0xa8] sm:$0xff]  ;;  %v499_v42 = vld [vmem:[%s1184_s2 + $0xc0] sm:$0xff] }
  0x11   :  { %v305_v37 = vld [vmem:[%s1184_s2 + $0x70] sm:$0xff]  ;;  %v560_v45 = vld [vmem:[%s1184_s2 + $0xd8] sm:$0xff]  ;;  %v664_v0 = vld [vmem:[%s1184_s2 + $0x100] sm:$0xff] }
  0x12   :  { %158 = vperm.xlu1 %862, %v153_v11   ;;  %168 = vperm.xlu0 %861, %v155_v12   ;;  %v377_v38 = vld [vmem:[%s1184_s2 + $0x90] sm:$0xff]  ;;  %v85_v54 = vld [vmem:[%s1183_s1 + $0x18] sm:$0x1] }
  0x13   :  { %v111_v58 = vunpack.c.l.b16 %v85_v54  ;;  %v306_v59 = vld [vmem:[%s1184_s2 + $0x78] sm:$0xff]  ;;  %v842_v62 = vld [vmem:[%s1183_s1 + $0x10] sm:$0xff] }
  0x15   :  { %v113_v63 = vpack.c.b16 %v111_v58, %v111_v58 }
  0x17   :  { %98 = vperm.xlu2 %863, %v89_v34  }
  0x19   :  { %772 = vmatmul.msk.bf16.gmra.mxu0 %vm51_vm1, %v50_v14 }
  0x1a   :  { %219 = vperm.xlu1 %862, %v214_v15   ;;  %229 = vperm.xlu0 %861, %v216_v16  }
  0x1f   :  { %163 = vperm.xlu2 %863, %v154_v35  }
  0x22   :  { %310 = vperm.xlu1 %862, %v304_v17   ;;  %276 = vperm.xlu0 %861, %v273_v18  }
  0x27   :  { %224 = vperm.xlu2 %863, %v215_v36  }
  0x2a   :  { %381 = vperm.xlu1 %862, %v376_v19   ;;  %391 = vperm.xlu0 %861, %v378_v20   ;;  %v843_v19 = vld [vmem:[%s1183_s1 + $0x20] sm:$0xff]  ;;  %v150_v20 = vld [vmem:[%s1183_s1 + $0x28] sm:$0x1] }
  0x2f   :  { %315 = vperm.xlu2 %863, %v305_v37  }
  0x32   :  { %442 = vperm.xlu1 %862, %v437_v21   ;;  %452 = vperm.xlu0 %861, %v439_v22   ;;  %v176_v21 = vunpack.c.l.b16 %v150_v20 }
  0x34   :  { %v178_v22 = vpack.c.b16 %v176_v21, %v176_v21 }
  0x37   :  { %386 = vperm.xlu2 %863, %v377_v38  }
  0x3a   :  { %503 = vperm.xlu1 %862, %v498_v23   ;;  %513 = vperm.xlu0 %861, %v500_v24  }
  0x3f   :  { %447 = vperm.xlu2 %863, %v438_v40   ;;  %v211_v40 = vld [vmem:[%s1183_s1 + $0x38] sm:$0x1] }
  0x42   :  { %564 = vperm.xlu1 %862, %v559_v25   ;;  %574 = vperm.xlu0 %861, %v561_v26  }
  0x47   :  { %508 = vperm.xlu2 %863, %v499_v42  }
  0x4a   :  { %628 = vperm.xlu1 %862, %v620_v27   ;;  %623 = vperm.xlu0 %861, %v619_v28  }
  0x4f   :  { %569 = vperm.xlu2 %863, %v560_v45  }
  0x52   :  { %669 = vperm.xlu1 %862, %v663_v29   ;;  %325 = vperm.xlu0 %861, %v307_v30  }
  0x57   :  { %320 = vperm.xlu2 %863, %v306_v59  }
  0x5a   :  { %684 = vperm.xlu1 %862, %v666_v32   ;;  %679 = vperm.xlu0 %861, %v665_v33  }
  0x5f   :  { %674 = vperm.xlu2 %863, %v664_v0  }
  0x69   :  { %v94_v1 = vpop.permute.xlu2 %93 }
  0x71   :  { %v99_v10 = vpop.permute.xlu2 %98 }
  0x74   :  { %v41_v43 = vpop.permute.xlu0 %40  ;;  %v36_v47 = vpop.permute.xlu1 %35 }
  0x79   :  { %v164_v28 = vpop.permute.xlu2 %163 }
  0x7c   :  { %v31_v51 = vpop.permute.xlu0 %30  ;;  %v104_v3 = vpop.permute.xlu1 %103 }
  0x84   :  { %v169_v25 = vpop.permute.xlu0 %168  ;;  %v159_v31 = vpop.permute.xlu1 %158 }
  0x86   :  { %v71_v39 = vpop.f32.mrf.mxu0 }
  0x87   :  { %v72_v52 = vadd.f32 %v71_v39, %v31_v51  ;;  %v844_v39 = vld [vmem:[%s1183_s1 + $0x30] sm:$0xff] }
  0x89   :  { %v80_v60 = vmax.f32 %v72_v52, 0.0 }
  0x8c   :  { %v230_v45 = vpop.permute.xlu0 %229  ;;  %v220_v52 = vpop.permute.xlu1 %219 }
  0x8e   :  { %v73_v41 = vpop.f32.mrf.mxu0 }
  0x8f   :  { %v74_v48 = vadd.f32 %v73_v41, %v36_v47  ;;  %v237_v41 = vunpack.c.l.b16 %v211_v40 }
  0x91   :  { %v81_v55 = vmax.f32 %v74_v48, 0.0  ;;  %v239_v42 = vpack.c.b16 %v237_v41, %v237_v41  ;;  %v225_v48 = vpop.permute.xlu2 %224 }
  0x93   :  { %v86_v61 = vpack.c.bf16 %v81_v55, %v80_v60  ;;  %v270_v60 = vld [vmem:[%s1183_s1 + $0x40] sm:$0xf] }
  0x96   :  { %v76_v44 = vpop.f32.mrf.mxu0 }
  0x97   :  { %v77_v46 = vadd.f32 %v76_v44, %v41_v43 }
  0x99   :  { %v82_v49 = vmax.f32 %v77_v46, 0.0 }
  0x9b   :  { %v87_v53 = vpack.c.bf16 %v82_v49, %v82_v49 }
  0x9d   :  { %v125_v56 = vand.u32 %v1070_v50, %v87_v53 }
  0x9e   :  { %v78_v57 = vpop.f32.mrf.mxu0 }
  0x9f   :  { %133 = vmatpush.bf16.msrb.mxu0 %v125_v56  ;;  %854 = vmatpush.bf16.msra.mxu1 %v125_v56 }
  0xa3   :  { %134 = vmatpush.bf16.msrb.mxu0 %v86_v61  ;;  %855 = vmatpush.bf16.msra.mxu1 %v86_v61  ;;  %v277_v61 = vpop.permute.xlu0 %276 }
  0xa6   :  { %777 = vmatmul.msk.bf16.vlgmr.msrb.gmra.mxu0 %vm114_vm3, %v842_v62  ;;  %778 = vmatmul.msk.bf16.vlgmr.msra.gmra.mxu1 %vm114_vm3, %v113_v63 }
 0x123   :  { %v136_v5 = vpop.f32.mrf.mxu0  ;;  %v141_v6 = vpop.f32.mrf.mxu1 }
 0x124   :  { %v142_v7 = vadd.f32 %v141_v6, %v104_v3  ;;  %v137_v11 = vadd.f32 %v136_v5, %v94_v1  ;;  %v845_v5 = vld [vmem:[%s1183_s1 + $0x48] sm:$0xff] }
 0x126   :  { %v147_v8 = vmax.f32 %v142_v7, 0.0  ;;  %v145_v16 = vmax.f32 %v137_v11, 0.0  ;;  %v846_v7 = vld [vmem:[%s1183_s1 + $0x50] sm:$0xff]  ;;  %v316_v11 = vpop.permute.xlu2 %315 }
 0x128   :  { %v152_v9 = vpack.c.bf16 %v147_v8, %v147_v8 }
 0x12a   :  { %v186_v12 = vand.u32 %v152_v9, %v1070_v50  ;;  %v311_v9 = vpop.permute.xlu1 %310 }
 0x12b   :  { %v138_v13 = vpop.f32.mrf.mxu0  ;;  %v143_v14 = vpop.f32.mrf.mxu1 }
 0x12c   :  { %v139_v15 = vadd.f32 %v138_v13, %v99_v10  ;;  %194 = vmatpush.bf16.msra.mxu2 %v186_v12 }
 0x12e   :  { %v146_v17 = vmax.f32 %v139_v15, 0.0 }
 0x130   :  { %v151_v18 = vpack.c.bf16 %v146_v17, %v145_v16 }
 0x132   :  { %195 = vmatpush.bf16.msra.mxu2 %v151_v18  ;;  %v847_v18 = vld [vmem:[%s1183_s1 + $0x58] sm:$0xff] }
 0x135   :  { %783 = vmatmul.msk.bf16.vlgmr.msra.gmra.mxu2 %vm114_vm3, %v843_v19 }
 0x145   :  { %784 = vmatmul.msk.bf16.gmra.mxu2 %vm114_vm3, %v178_v22  ;;  %v392_v22 = vpop.permute.xlu0 %391 }
 0x1b8   :  { %v197_v23 = vpop.f32.mrf.mxu2 }
 0x1b9   :  { %v198_v32 = vadd.f32 %v197_v23, %v159_v31 }
 0x1bb   :  { %v206_v37 = vmax.f32 %v198_v32, 0.0 }
 0x1c0   :  { %v199_v24 = vpop.f32.mrf.mxu2 }
 0x1c1   :  { %v200_v29 = vadd.f32 %v199_v24, %v164_v28  ;;  %v382_v28 = vpop.permute.xlu1 %381 }
 0x1c3   :  { %v207_v34 = vmax.f32 %v200_v29, 0.0 }
 0x1c5   :  { %v212_v38 = vpack.c.bf16 %v207_v34, %v206_v37  ;;  %v434_v37 = vld [vmem:[%s1183_s1 + $0x70] sm:$0x1] }
 0x1c8   :  { %v202_v26 = vpop.f32.mrf.mxu2 }
 0x1c9   :  { %v203_v27 = vadd.f32 %v202_v26, %v169_v25  ;;  %v387_v25 = vpop.permute.xlu2 %386 }
 0x1cb   :  { %v208_v30 = vmax.f32 %v203_v27, 0.0 }
 0x1cd   :  { %v213_v33 = vpack.c.bf16 %v208_v30, %v208_v30 }
 0x1cf   :  { %v247_v35 = vand.u32 %v213_v33, %v1070_v50 }
 0x1d0   :  { %v204_v36 = vpop.f32.mrf.mxu2 }
 0x1d1   :  { %255 = vmatpush.bf16.msra.mxu3 %v247_v35  ;;  %v848_v36 = vld [vmem:[%s1183_s1 + $0x68] sm:$0xff] }
 0x1d5   :  { %256 = vmatpush.bf16.msra.mxu3 %v212_v38  ;;  %v460_v38 = vunpack.c.l.b16 %v434_v37  ;;  %v851_v37 = vld [vmem:[%s1183_s1 + $0x98] sm:$0xff] }
 0x1d8   :  { %789 = vmatmul.msk.bf16.vlgmr.msra.gmra.mxu3 %vm114_vm3, %v844_v39  ;;  %v462_v39 = vpack.c.b16 %v460_v38, %v460_v38 }
 0x1e8   :  { %790 = vmatmul.msk.bf16.gmra.mxu3 %vm114_vm3, %v239_v42  ;;  %v453_v42 = vpop.permute.xlu0 %452 }
 0x25b   :  { %v258_v43 = vpop.f32.mrf.mxu3 }
 0x25c   :  { %v259_v53 = vadd.f32 %v258_v43, %v220_v52 }
 0x25e   :  { %v267_v58 = vmax.f32 %v259_v53, 0.0 }
 0x263   :  { %v260_v44 = vpop.f32.mrf.mxu3 }
 0x264   :  { %v261_v49 = vadd.f32 %v260_v44, %v225_v48  ;;  %v443_v48 = vpop.permute.xlu1 %442 }
 0x266   :  { %v268_v55 = vmax.f32 %v261_v49, 0.0 }
 0x268   :  { %v271_v59 = vpack.c.bf16 %v268_v55, %v267_v58  ;;  %v495_v58 = vld [vmem:[%s1183_s1 + $0x80] sm:$0x1] }
 0x26b   :  { %v263_v46 = vpop.f32.mrf.mxu3 }
 0x26c   :  { %v264_v47 = vadd.f32 %v263_v46, %v230_v45  ;;  %v448_v45 = vpop.permute.xlu2 %447 }
 0x26e   :  { %v269_v51 = vmax.f32 %v264_v47, 0.0 }
 0x270   :  { %v272_v54 = vpack.c.bf16 %v269_v51, %v269_v51 }
 0x272   :  { %v283_v56 = vand.u32 %v272_v54, %v1070_v50 }
 0x273   :  { %v265_v57 = vpop.f32.mrf.mxu3 }
 0x274   :  { %291 = vmatpush.bf16.msra.mxu0 %v283_v56  ;;  %v849_v57 = vld [vmem:[%s1183_s1 + $0x78] sm:$0xff] }
 0x278   :  { %292 = vmatpush.bf16.msra.mxu0 %v271_v59  ;;  %v521_v59 = vunpack.c.l.b16 %v495_v58 }
 0x27b   :  { %791 = vmatmul.msk.bf16.vlgmr.msra.gmra.mxu0 %vm114_vm3, %v270_v60  ;;  %v523_v60 = vpack.c.b16 %v521_v59, %v521_v59 }
 0x2f8   :  { %v294_v62 = vpop.f32.mrf.mxu0 }
 0x2f9   :  { %v295_v63 = vadd.f32 %v294_v62, %v277_v61 }
 0x2fb   :  { %v298_v0 = vmax.f32 %v295_v63, 0.0  ;;  %v514_v63 = vpop.permute.xlu0 %513 }
 0x2fd   :  { %v303_v1 = vpack.c.bf16 %v298_v0, %v298_v0 }
 0x2ff   :  { %v347_v3 = vsel %vm345_vm4, %v303_v1, 0 }
 0x300   :  { %v296_v6 = vpop.f32.mrf.mxu0  ;;  %356 = vmatpush.bf16.msrb.mxu1 %v347_v3  ;;  %v509_v3 = vpop.permute.xlu2 %508 }
 0x303   :  { %800 = vmatmul.msk.bf16.vlgmr.msrb.gmra.mxu1 %vm338_vm5, %v845_v5 }
 0x313   :  { %801 = vmatmul.msk.bf16.gmra.mxu1 %vm338_vm5, %v846_v7  ;;  %v504_v7 = vpop.permute.xlu1 %503 }
 0x380   :  { %v358_v8 = vpop.f32.mrf.mxu1 }
 0x381   :  { %v359_v10 = vadd.f32 %v358_v8, %v311_v9 }
 0x383   :  { %v1117_v14 = vsub.f32 %v955_v2, %v359_v10  ;;  %v374_v2 = vld [vmem:[%s1183_s1 + $0x60] sm:$0x1] }
 0x384   :  { %v399_v19 = vunpack.c.l.b16 %v374_v2 }
 0x386   :  { %v401_v20 = vpack.c.b16 %v399_v19, %v399_v19 }
 0x388   :  { %v360_v12 = vpop.f32.mrf.mxu1 }
 0x389   :  { %v361_v13 = vadd.f32 %v360_v12, %v316_v11 }
 0x38b   :  { %v1120_v15 = vsub.f32 %v962_v4, %v361_v13 }
 0x38d   :  { %v375_v16 = vpack.c.bf16 %v1120_v15, %v1117_v14 }
 0x38f   :  { %v409_v17 = vsel %vm58_vm0, %v375_v16, 0 }
 0x390   :  { %418 = vmatpush.bf16.msrb.mxu2 %v409_v17  ;;  %v850_v17 = vld [vmem:[%s1183_s1 + $0x88] sm:$0xff] }
 0x393   :  { %806 = vmatmul.msk.bf16.vlgmr.msrb.gmra.mxu2 %vm51_vm1, %v847_v18  ;;  %v556_v18 = vld [vmem:[%s1183_s1 + $0x90] sm:$0x1] }
 0x394   :  { %v582_v2 = vunpack.c.l.b16 %v556_v18 }
 0x396   :  { %v584_v19 = vpack.c.b16 %v582_v2, %v582_v2 }
 0x3a3   :  { %807 = vmatmul.msk.bf16.gmra.mxu2 %vm51_vm1, %v401_v20  ;;  %v363_v20 = vpop.f32.mrf.mxu1 }
 0x416   :  { %v420_v4 = vpop.f32.mrf.mxu2 }
 0x417   :  { %v421_v29 = vadd.f32 %v420_v4, %v382_v28  ;;  %v1160_v4 = vpop.f32.mrf.mxu1 }
 0x419   :  { %v429_v34 = vmax.f32 %v421_v29, 0.0  ;;  %v565_v29 = vpop.permute.xlu1 %564 }
 0x41e   :  { %v422_v21 = vpop.f32.mrf.mxu2 }
 0x41f   :  { %v423_v26 = vadd.f32 %v422_v21, %v387_v25 }
 0x421   :  { %v430_v31 = vmax.f32 %v423_v26, 0.0  ;;  %v570_v26 = vpop.permute.xlu2 %569 }
 0x423   :  { %v435_v35 = vpack.c.bf16 %v430_v31, %v429_v34 }
 0x426   :  { %v425_v23 = vpop.f32.mrf.mxu2 }
 0x427   :  { %v426_v24 = vadd.f32 %v425_v23, %v392_v22  ;;  %v575_v23 = vpop.permute.xlu0 %574 }
 0x429   :  { %v431_v27 = vmax.f32 %v426_v24, 0.0 }
 0x42b   :  { %v436_v30 = vpack.c.bf16 %v431_v27, %v431_v27 }
 0x42d   :  { %v470_v32 = vand.u32 %v436_v30, %v1070_v50 }
 0x42e   :  { %v427_v33 = vpop.f32.mrf.mxu2 }
 0x42f   :  { %478 = vmatpush.bf16.msrb.mxu3 %v470_v32 }
 0x433   :  { %479 = vmatpush.bf16.msrb.mxu3 %v435_v35 }
 0x436   :  { %812 = vmatmul.msk.bf16.vlgmr.msrb.gmra.mxu3 %vm114_vm3, %v848_v36 }
 0x446   :  { %813 = vmatmul.msk.bf16.gmra.mxu3 %vm114_vm3, %v462_v39  ;;  %v624_v39 = vpop.permute.xlu0 %623 }
 0x4b9   :  { %v481_v40 = vpop.f32.mrf.mxu3 }
 0x4ba   :  { %v482_v49 = vadd.f32 %v481_v40, %v443_v48  ;;  %v321_v48 = vpop.permute.xlu2 %320 }
 0x4bc   :  { %v490_v55 = vmax.f32 %v482_v49, 0.0 }
 0x4c1   :  { %v483_v41 = vpop.f32.mrf.mxu3 }
 0x4c2   :  { %v484_v46 = vadd.f32 %v483_v41, %v448_v45  ;;  %v629_v41 = vpop.permute.xlu1 %628 }
 0x4c4   :  { %v491_v52 = vmax.f32 %v484_v46, 0.0  ;;  %v852_v46 = vld [vmem:[%s1183_s1 + $0xa0] sm:$0xff] }
 0x4c6   :  { %v496_v56 = vpack.c.bf16 %v491_v52, %v490_v55  ;;  %v675_v55 = vpop.permute.xlu2 %674 }
 0x4c9   :  { %v486_v43 = vpop.f32.mrf.mxu3 }
 0x4ca   :  { %v487_v44 = vadd.f32 %v486_v43, %v453_v42  ;;  %v670_v49 = vpop.permute.xlu1 %669 }
 0x4cc   :  { %v492_v47 = vmax.f32 %v487_v44, 0.0 }
 0x4ce   :  { %v497_v51 = vpack.c.bf16 %v492_v47, %v492_v47  ;;  %v853_v47 = vld [vmem:[%s1183_s1 + $0xa8] sm:$0xff]  ;;  %s918_s1 = smov 128  }
 0x4d0   :  { %v531_v53 = vand.u32 %v497_v51, %v1070_v50 }
 0x4d1   :  { %v488_v54 = vpop.f32.mrf.mxu3 }
 0x4d2   :  { %539 = vmatpush.bf16.msrb.mxu0 %v531_v53  ;;  %v326_v54 = vpop.permute.xlu0 %325 }
 0x4d6   :  { %540 = vmatpush.bf16.msrb.mxu0 %v496_v56 }
 0x4d9   :  { %818 = vmatmul.msk.bf16.vlgmr.msrb.gmra.mxu0 %vm114_vm3, %v849_v57 }
 0x4e9   :  { %819 = vmatmul.msk.bf16.gmra.mxu0 %vm114_vm3, %v523_v60  ;;  %v364_v60 = vadd.f32 %v363_v20, %v321_v48 }
 0x556   :  { %v542_v61 = vpop.f32.mrf.mxu0 }
 0x557   :  { %v543_v8 = vadd.f32 %v542_v61, %v504_v7 }
 0x559   :  { %v551_v13 = vmax.f32 %v543_v8, 0.0 }
 0x55e   :  { %v544_v62 = vpop.f32.mrf.mxu0 }
 0x55f   :  { %v545_v5 = vadd.f32 %v544_v62, %v509_v3 }
 0x561   :  { %v552_v10 = vmax.f32 %v545_v5, 0.0 }
 0x563   :  { %v557_v16 = vpack.c.bf16 %v552_v10, %v551_v13 }
 0x566   :  { %v547_v0 = vpop.f32.mrf.mxu0 }
 0x567   :  { %v548_v1 = vadd.f32 %v547_v0, %v514_v63  ;;  %v685_v63 = vpop.permute.xlu1 %684 }
 0x569   :  { %v553_v6 = vmax.f32 %v548_v1, 0.0 }
 0x56b   :  { %v558_v9 = vpack.c.bf16 %v553_v6, %v553_v6 }
 0x56d   :  { %v592_v11 = vand.u32 %v558_v9, %v1070_v50 }
 0x56e   :  { %v549_v12 = vpop.f32.mrf.mxu0 }
 0x56f   :  { %600 = vmatpush.bf16.msra.mxu1 %v592_v11 }
 0x573   :  { %601 = vmatpush.bf16.msra.mxu1 %v557_v16 }
 0x576   :  { %824 = vmatmul.msk.bf16.vlgmr.msra.gmra.mxu1 %vm114_vm3, %v850_v17 }
 0x586   :  { %825 = vmatmul.msk.bf16.gmra.mxu1 %vm114_vm3, %v584_v19 }
 0x5f3   :  { %v603_v21 = vpop.f32.mrf.mxu1 }
 0x5f4   :  { %v604_v30 = vadd.f32 %v603_v21, %v565_v29 }
 0x5f6   :  { %v612_v35 = vmax.f32 %v604_v30, 0.0 }
 0x5fb   :  { %v605_v22 = vpop.f32.mrf.mxu1 }
 0x5fc   :  { %v606_v27 = vadd.f32 %v605_v22, %v570_v26 }
 0x5fe   :  { %v613_v32 = vmax.f32 %v606_v27, 0.0 }
 0x600   :  { %v617_v36 = vpack.c.bf16 %v613_v32, %v612_v35 }
 0x603   :  { %v608_v24 = vpop.f32.mrf.mxu1 }
 0x604   :  { %v609_v25 = vadd.f32 %v608_v24, %v575_v23 }
 0x606   :  { %v614_v28 = vmax.f32 %v609_v25, 0.0 }
 0x608   :  { %v618_v31 = vpack.c.bf16 %v614_v28, %v614_v28 }
 0x60a   :  { %v640_v33 = vand.u32 %v618_v31, %v1070_v50 }
 0x60b   :  { %v610_v34 = vpop.f32.mrf.mxu1 }
 0x60c   :  { %648 = vmatpush.bf16.msra.mxu2 %v640_v33 }
 0x610   :  { %649 = vmatpush.bf16.msra.mxu2 %v617_v36 }
 0x613   :  { %830 = vmatmul.msk.bf16.vlgmr.msra.gmra.mxu2 %vm114_vm3, %v851_v37 }
 0x696   :  { %v651_v38 = vpop.f32.mrf.mxu2 }
 0x697   :  { %v652_v40 = vadd.f32 %v651_v38, %v624_v39 }
 0x699   :  { %v656_v44 = vmax.f32 %v652_v40, 0.0 }
 0x69e   :  { %v653_v42 = vpop.f32.mrf.mxu2 }
 0x69f   :  { %v654_v43 = vadd.f32 %v653_v42, %v629_v41 }
 0x6a1   :  { %v657_v45 = vmax.f32 %v654_v43, 0.0 }
 0x6a3   :  { %v662_v50 = vpack.c.bf16 %v657_v45, %v656_v44 }
 0x6a5   :  { %711 = vmatpush.bf16.msra.mxu3 %v662_v50 }
 0x6a8   :  { %839 = vmatmul.msk.bf16.vlgmr.msra.gmra.mxu3 %vm697_vm6, %v852_v46 }
 0x6b8   :  { %840 = vmatmul.msk.bf16.gmra.mxu3 %vm697_vm6, %v853_v47 }
 0x72b   :  { %v713_v51 = vpop.f32.mrf.mxu3 }
 0x72c   :  { %v714_v52 = vadd.f32 %v713_v51, %v670_v49 }
 0x72e   :  { %v723_v53 = vsub.f32 %v1117_v14, %v714_v52  ;;  %v680_v14 = vpop.permute.xlu0 %679 }
 0x730   :  { %727 = vst [vmem:[#allocation2] sm:$0xff] %v723_v53 }
 0x733   :  { %v715_v56 = vpop.f32.mrf.mxu3 }
 0x734   :  { %v716_v57 = vadd.f32 %v715_v56, %v675_v55 }
 0x736   :  { %v724_v58 = vsub.f32 %v1120_v15, %v716_v57  ;;  %v366_v15 = vadd.f32 %v1160_v4, %v326_v54 }
 0x738   :  { %728 = vst [vmem:[#allocation2 + $0x8] sm:$0x3] %v724_v58 }
 0x739   :  { %743 = dma.vmem_to_hbm [thread:$0]  %s736_s24, 256, %s738_s26, [#allocation3], %s918_s1, %s918_s1, %s919_s27  }
 0x73b   :  { %v718_v59 = vpop.f32.mrf.mxu3 }
 0x73c   :  { %v719_v61 = vadd.f32 %v718_v59, %v680_v14 }
 0x73e   :  { %v725_v62 = vadd.f32 %v719_v61, %v364_v60 }
 0x740   :  { %729 = vst [vmem:[#allocation4] sm:$0xff] %v725_v62 }
 0x743   :  { %v720_v0 = vpop.f32.mrf.mxu3 }
 0x744   :  { %v721_v1 = vadd.f32 %v720_v0, %v685_v63 }
 0x746   :  { %v726_v3 = vadd.f32 %v721_v1, %v366_v15 }
 0x748   :  { %730 = vst [vmem:[#allocation4 + $0x8] sm:$0x3] %v726_v3 }
 0x749   :  { %756 = dma.vmem_to_hbm [thread:$0]  %s749_s28, 256, %s751_s5, [#allocation5], %s918_s1, %s918_s1, %s919_s27  }
 0x74a   :  { %912 = dma.done.wait [#allocation3], 256  }
 0x74b   :  { %913 = vsyncadd [#allocation3], 4294967040 }
 0x74c   :  { %914 = dma.done.wait [#allocation5], 256  }
 0x74d   :  { %915 = vsyncadd [#allocation5], 4294967040 }
 0x74e   :  { %765 = vsyncpa [#allocation3], 1 }
 0x74f   :  { %766 = vsyncpa [#allocation5], 1 }

</bundles_post_ra>
